<compile_context>
chip_gen: v5e
topology: v5e:2x2
jax: 0.10.0
libtpu: 0.0.40
codegen_flags: <defaults>
</compile_context>

<pallas_src>
import functools

import jax
import jax.numpy as jnp
from jax.experimental import pallas as pl
from jax.experimental.pallas import tpu as pltpu


def _round_up(x, m):
    return ((x + m - 1) // m) * m


def _log_sigmoid(x):
    # log(sigmoid(x)) = min(x, 0) - log1p(exp(-|x|))   (numerically stable)
    return jnp.minimum(x, 0.0) - jnp.log1p(jnp.exp(-jnp.abs(x)))


def _accumulate_and_finalize(diff, out_ref, acc_ref, *, n_rows, tmp, pack):
    """diff: (tmp, pack) packed per-row score differences for this tile."""
    pid = pl.program_id(0)
    log_sig = _log_sigmoid(diff)

    # Mask padded / remainder original rows (mask BEFORE accumulation so any
    # garbage from ragged HBM blocks is discarded).
    packed_row = pid * tmp + jax.lax.broadcasted_iota(jnp.int32, (tmp, pack), 0)
    seg = jax.lax.broadcasted_iota(jnp.int32, (tmp, pack), 1)
    orig_row = packed_row * pack + seg
    log_sig = jnp.where(orig_row < n_rows, log_sig, 0.0)

    acc_ref[...] += log_sig                                   # vector accumulate (VPU)

    @pl.when(pid == pl.num_programs(0) - 1)
    def _():
        col = jnp.sum(acc_ref[...], axis=0, keepdims=True)    # (1, pack)
        tot = jnp.sum(col, axis=1, keepdims=True)             # (1, 1)
        out_ref[...] = tot * (1.0 / n_rows)


def _bpr_summary_kernel(pos_ref, neg_ref, tmat_ref, out_ref, acc_ref,
                        *, n_rows, tmp, pack):
    """node is a (1, n_h) summary vector: t = node @ W precomputed in wrapper."""
    @pl.when(pl.program_id(0) == 0)
    def _():
        acc_ref[...] = jnp.zeros_like(acc_ref)

    d = pos_ref[...].astype(jnp.float32) - neg_ref[...].astype(jnp.float32)
    # (tmp, P*n_h) @ (P*n_h, P): per-original-row score difference, one MXU pass.
    diff = jnp.dot(d, tmat_ref[...], preferred_element_type=jnp.float32)
    _accumulate_and_finalize(diff, out_ref, acc_ref, n_rows=n_rows, tmp=tmp, pack=pack)


def _bpr_rowwise_kernel(node_ref, pos_ref, neg_ref, wbd_ref, seg_ref, out_ref, acc_ref,
                        *, n_rows, tmp, pack):
    """node has one row per subgraph row (lane-packed like pos/neg)."""
    @pl.when(pl.program_id(0) == 0)
    def _():
        acc_ref[...] = jnp.zeros_like(acc_ref)

    t = jnp.dot(node_ref[...].astype(jnp.float32), wbd_ref[...],
                preferred_element_type=jnp.float32)            # (tmp, P*n_h)
    d = pos_ref[...].astype(jnp.float32) - neg_ref[...].astype(jnp.float32)
    prod = t * d
    # Segment sum over each n_h-wide feature block -> (tmp, P) score differences.
    diff = jnp.dot(prod, seg_ref[...], preferred_element_type=jnp.float32)
    _accumulate_and_finalize(diff, out_ref, acc_ref, n_rows=n_rows, tmp=tmp, pack=pack)


def bpr_forward(node, subgraph_pos, subgraph_neg, weight, bias=None, *, tm=8192):
    """node: (1 or N, n_h); subgraph_pos/neg: (N, n_h) (f32 or bf16);
    weight: (n_h, n_h) or (1, n_h, n_h); bias unused (cancels in sc_1 - sc_2).
    tm = original rows per grid step (2048-8192 recommended)."""
    del bias
    n, n_h = subgraph_pos.shape
    assert subgraph_neg.shape == (n, n_h)
    node_rows = node.shape[0]
    assert node.shape == (node_rows, n_h) and node_rows in (1, n)

    w = weight.reshape(n_h, n_h).astype(jnp.float32)

    # Lane-packing factor: pack P = 128 // n_h original rows into one 128-lane row.
    pack = 128 // n_h if (n_h <= 128 and 128 % n_h == 0) else 1
    lanes = pack * n_h

    # Pad rows to a multiple of `pack` (and >= 8 packed sublanes for tiny inputs).
    n_pad = _round_up(n, pack)
    if n_pad < 8 * pack:
        n_pad = 8 * pack

    def _pack_rows(x):
        if n_pad != n:
            x = jnp.pad(x, ((0, n_pad - n), (0, 0)))
        return x.reshape(n_pad // pack, lanes)        # contiguous -> free reshape

    pos_p = _pack_rows(subgraph_pos)
    neg_p = _pack_rows(subgraph_neg)
    np_rows = n_pad // pack

    # Packed-row tile size: `tm` original rows per grid step, multiple of 16
    # sublanes (works for f32 and bf16 streams).
    max_tmp = max(16, ((max(tm, 16) // pack) // 16) * 16)
    if np_rows <= max_tmp:
        tmp = np_rows                       # single block; equals full array dim
        grid = (1,)
    else:
        tmp = max_tmp
        grid = (pl.cdiv(np_rows, tmp),)     # ragged last block handled by the mask

    summary = node_rows == 1
    if summary:
        # Hoist node @ W out of the grid loop entirely.
        t = jnp.dot(node.astype(jnp.float32), w)                        # (1, n_h)
        eye = jnp.eye(pack, dtype=jnp.float32)
        tmat = (eye[:, None, :] * t[0][None, :, None]).reshape(lanes, pack)
        kernel = functools.partial(_bpr_summary_kernel, n_rows=n, tmp=tmp, pack=pack)
        in_specs = [
            pl.BlockSpec((tmp, lanes), lambda i: (i, 0)),    # pos (streamed)
            pl.BlockSpec((tmp, lanes), lambda i: (i, 0)),    # neg (streamed)
            pl.BlockSpec((lanes, pack), lambda i: (0, 0)),   # blockdiag(t) (resident)
        ]
        operands = (pos_p, neg_p, tmat)
        n_streams = 2
        flops = n * (3 * n_h + 6)
    else:
        node_p = _pack_rows(node)
        w_bd = jnp.kron(jnp.eye(pack, dtype=jnp.float32), w)            # (lanes, lanes)
        s_mat = jnp.repeat(jnp.eye(pack, dtype=jnp.float32), n_h, axis=0)  # (lanes, pack)
        kernel = functools.partial(_bpr_rowwise_kernel, n_rows=n, tmp=tmp, pack=pack)
        in_specs = [
            pl.BlockSpec((tmp, lanes), lambda i: (i, 0)),    # node (streamed)
            pl.BlockSpec((tmp, lanes), lambda i: (i, 0)),    # pos (streamed)
            pl.BlockSpec((tmp, lanes), lambda i: (i, 0)),    # neg (streamed)
            pl.BlockSpec((lanes, lanes), lambda i: (0, 0)),  # blockdiag(W) (resident)
            pl.BlockSpec((lanes, pack), lambda i: (0, 0)),   # segment-sum matrix
        ]
        operands = (node_p, pos_p, neg_p, w_bd, s_mat)
        n_streams = 3
        flops = n * (2 * n_h * n_h + 4 * n_h + 6)

    # Explicit scoped-VMEM budget: double-buffered streams + vector accumulator
    # (lane-padded) + resident matrices, with headroom; clamped well under every
    # generation's physical VMEM (v5e default scoped limit is only 16 MiB).
    in_itemsize = max(jnp.dtype(subgraph_pos.dtype).itemsize,
                      jnp.dtype(subgraph_neg.dtype).itemsize,
                      jnp.dtype(node.dtype).itemsize)
    est = (n_streams * 2 * tmp * lanes * in_itemsize
           + tmp * 128 * 4
           + 2 * lanes * lanes * 4
           + (2 << 20))
    vmem_limit_bytes = int(min(max(2 * est, 16 << 20), 48 << 20))

    cost = pl.CostEstimate(
        flops=int(flops),
        transcendentals=int(2 * n),
        bytes_accessed=int(n_streams * n * n_h * in_itemsize + lanes * lanes * 4 + 4),
    )

    out = pl.pallas_call(
        kernel,
        out_shape=jax.ShapeDtypeStruct((1, 1), jnp.float32),
        grid_spec=pltpu.PrefetchScalarGridSpec(
            num_scalar_prefetch=0,
            grid=grid,
            in_specs=in_specs,
            out_specs=pl.BlockSpec((1, 1), lambda i: (0, 0)),
            scratch_shapes=[pltpu.VMEM((tmp, pack), jnp.float32)],   # vector accumulator
        ),
        compiler_params=pltpu.CompilerParams(
            dimension_semantics=("arbitrary",),      # single reduction axis
            vmem_limit_bytes=vmem_limit_bytes,
        ),
        cost_estimate=cost,
    )(*operands)
    return out[0, 0]


def init_params(key, n_h):
    # nn.Bilinear(n_h, n_h, 1) weight shape: (1, n_h, n_h); xavier_uniform_ init.
    fan_in = n_h * n_h
    fan_out = n_h
    bound = (6.0 / (fan_in + fan_out)) ** 0.5
    w = jax.random.uniform(key, (n_h, n_h), jnp.float32, minval=-bound, maxval=bound)
    b = jnp.zeros((), jnp.float32)
    return w, b


def _reference(node, pos, neg, w, b):
    # Pure-JAX reference of the PyTorch forward.
    if node.shape[0] == 1:
        node = jnp.broadcast_to(node, pos.shape)
    sc1 = jnp.einsum("ni,ij,nj->n", node, w, pos) + b
    sc2 = jnp.einsum("ni,ij,nj->n", node, w, neg) + b
    return jnp.mean(jnp.log(jax.nn.sigmoid(sc1 - sc2)))


if __name__ == "__main__":
    key = jax.random.PRNGKey(0)
    k_w, k_node, k_pos, k_neg, k_node1, k_pos2, k_neg2, k_node2 = jax.random.split(key, 8)

    n_h = 32   # hidden size
    N = 8      # number of nodes / subgraphs

    w, b = init_params(k_w, n_h)

    node = jax.random.normal(k_node, (N, n_h), jnp.float32)
    subgraph_pos = jax.random.normal(k_pos, (N, n_h), jnp.float32)
    subgraph_neg = jax.random.normal(k_neg, (N, n_h), jnp.float32)

    # Case 1: per-row node embeddings, (N, n_h) -> lane-packed rowwise kernel.
    out = jax.block_until_ready(bpr_forward(node, subgraph_pos, subgraph_neg, w, b))
    ref = _reference(node, subgraph_pos, subgraph_neg, w, b)
    assert jnp.allclose(out, ref, atol=2e-5, rtol=1e-4), (out, ref)

    # Case 2: (1, n_h) summary node (expand_as path) -> node@W hoisted, W not streamed.
    node1 = jax.random.normal(k_node1, (1, n_h), jnp.float32)
    out1 = jax.block_until_ready(bpr_forward(node1, subgraph_pos, subgraph_neg, w, b))
    ref1 = _reference(node1, subgraph_pos, subgraph_neg, w, b)
    assert jnp.allclose(out1, ref1, atol=2e-5, rtol=1e-4), (out1, ref1)

    # Case 3: multi-step grid with a partial/padded last block (summary path).
    N2 = 530
    pos2 = jax.random.normal(k_pos2, (N2, n_h), jnp.float32)
    neg2 = jax.random.normal(k_neg2, (N2, n_h), jnp.float32)
    out2 = jax.block_until_ready(bpr_forward(node1, pos2, neg2, w, b, tm=256))
    ref2 = _reference(node1, pos2, neg2, w, b)
    assert jnp.allclose(out2, ref2, atol=2e-5, rtol=1e-4), (out2, ref2)

    # Case 4: multi-step grid, per-row node path (exercises blockdiag(W) + segment sum).
    node2 = jax.random.normal(k_node2, (N2, n_h), jnp.float32)
    out3 = jax.block_until_ready(bpr_forward(node2, pos2, neg2, w, b, tm=256))
    ref3 = _reference(node2, pos2, neg2, w, b)
    assert jnp.allclose(out3, ref3, atol=2e-5, rtol=1e-4), (out3, ref3)

    print("KERNEL_OK")
</pallas_src>

<mosaic_0001>
module attributes {stable_mosaic.version = 11 : i64} {
  func.func @_bpr_rowwise_kernel(%arg0: i32, %arg1: memref<8x128xf32, #tpu.memory_space<vmem>>, %arg2: memref<8x128xf32, #tpu.memory_space<vmem>>, %arg3: memref<8x128xf32, #tpu.memory_space<vmem>>, %arg4: memref<128x128xf32, #tpu.memory_space<vmem>>, %arg5: memref<128x4xf32, #tpu.memory_space<vmem>>, %arg6: memref<1x1xf32, #tpu.memory_space<vmem>>, %arg7: memref<8x4xf32, #tpu.memory_space<vmem>>) attributes {dimension_semantics = [#tpu.dimension_semantics<arbitrary>], iteration_bounds = array<i64: 1>, scalar_prefetch = 0 : i64, scratch_operands = 1 : i64, tpu.core_type = #tpu.core_type<tc>, window_params = [{transform_indices = @transform_0, window_bounds = array<i64: 8, 128>}, {transform_indices = @transform_1, window_bounds = array<i64: 8, 128>}, {transform_indices = @transform_2, window_bounds = array<i64: 8, 128>}, {pipeline_mode = #tpu.pipeline_mode<synchronous>, transform_indices = @transform_3, window_bounds = array<i64: 128, 128>}, {pipeline_mode = #tpu.pipeline_mode<synchronous>, transform_indices = @transform_4, window_bounds = array<i64: 128, 4>}, {pipeline_mode = #tpu.pipeline_mode<synchronous>, transform_indices = @transform_5, window_bounds = array<i64: 1, 1>}]} {
    %c0_i32 = arith.constant 0 : i32
    %0 = arith.cmpi eq, %arg0, %c0_i32 : i32
    %1 = arith.extui %0 : i1 to i32
    %c0_i32_0 = arith.constant 0 : i32
    %2 = arith.cmpi ne, %1, %c0_i32_0 : i32
    scf.if %2 {
      %cst_21 = arith.constant 0.000000e+00 : f32
      %38 = vector.broadcast %cst_21 : f32 to vector<8x4xf32>
      %c0_22 = arith.constant 0 : index
      %c0_23 = arith.constant 0 : index
      %39 = vector.load %arg7[%c0_22, %c0_23] : memref<8x4xf32, #tpu.memory_space<vmem>>, vector<8x4xf32>
      tpu.vector_store %arg7[%c0_22, %c0_23], %38 {strides = array<i32>} : memref<8x4xf32, #tpu.memory_space<vmem>>, vector<8x4xf32>,
    } else {
    }
    %c0 = arith.constant 0 : index
    %c0_1 = arith.constant 0 : index
    %3 = vector.load %arg1[%c0, %c0_1] : memref<8x128xf32, #tpu.memory_space<vmem>>, vector<8x128xf32>
    %c0_2 = arith.constant 0 : index
    %c0_3 = arith.constant 0 : index
    %4 = vector.load %arg4[%c0_2, %c0_3] : memref<128x128xf32, #tpu.memory_space<vmem>>, vector<128x128xf32>
    %cst = arith.constant dense<0.000000e+00> : vector<8x128xf32>
    %5 = tpu.matmul %3, %4, %cst {dimension_numbers = #tpu.dot_dimension_numbers<[1], [0], [0], [1], [0, 0, 1, 1], [], []>} : vector<8x128xf32>, vector<128x128xf32>, vector<8x128xf32> -> vector<8x128xf32>
    %c0_4 = arith.constant 0 : index
    %c0_5 = arith.constant 0 : index
    %6 = vector.load %arg2[%c0_4, %c0_5] : memref<8x128xf32, #tpu.memory_space<vmem>>, vector<8x128xf32>
    %c0_6 = arith.constant 0 : index
    %c0_7 = arith.constant 0 : index
    %7 = vector.load %arg3[%c0_6, %c0_7] : memref<8x128xf32, #tpu.memory_space<vmem>>, vector<8x128xf32>
    %8 = arith.subf %6, %7 : vector<8x128xf32>
    %9 = arith.mulf %5, %8 : vector<8x128xf32>
    %c0_8 = arith.constant 0 : index
    %c0_9 = arith.constant 0 : index
    %10 = vector.load %arg5[%c0_8, %c0_9] : memref<128x4xf32, #tpu.memory_space<vmem>>, vector<128x4xf32>
    %cst_10 = arith.constant dense<0.000000e+00> : vector<8x4xf32>
    %11 = tpu.matmul %9, %10, %cst_10 {dimension_numbers = #tpu.dot_dimension_numbers<[1], [0], [0], [1], [0, 0, 1, 1], [], []>} : vector<8x128xf32>, vector<128x4xf32>, vector<8x4xf32> -> vector<8x4xf32>
    %cst_11 = arith.constant 0.000000e+00 : f32
    %12 = vector.broadcast %cst_11 : f32 to vector<8x4xf32>
    %13 = arith.minimumf %11, %12 : vector<8x4xf32>
    %14 = math.absf %11 : vector<8x4xf32>
    %cst_12 = arith.constant 0.000000e+00 : f32
    %15 = vector.broadcast %cst_12 : f32 to vector<8x4xf32>
    %16 = arith.subf %15, %14 : vector<8x4xf32>
    %17 = math.exp %16 : vector<8x4xf32>
    %18 = math.log1p %17 : vector<8x4xf32>
    %19 = arith.subf %13, %18 : vector<8x4xf32>
    %c8_i32 = arith.constant 8 : i32
    %20 = arith.muli %arg0, %c8_i32 : i32
    %21 = tpu.iota {dimensions = array<i32: 0>} : vector<8x4xi32>
    %22 = vector.broadcast %20 : i32 to vector<8x4xi32>
    %23 = arith.addi %22, %21 : vector<8x4xi32>
    %24 = tpu.iota {dimensions = array<i32: 1>} : vector<8x4xi32>
    %c4_i32 = arith.constant 4 : i32
    %25 = vector.broadcast %c4_i32 : i32 to vector<8x4xi32>
    %26 = arith.muli %23, %25 : vector<8x4xi32>
    %27 = arith.addi %26, %24 : vector<8x4xi32>
    %c8_i32_13 = arith.constant 8 : i32
    %28 = vector.broadcast %c8_i32_13 : i32 to vector<8x4xi32>
    %29 = arith.cmpi slt, %27, %28 : vector<8x4xi32>
    %cst_14 = arith.constant 0.000000e+00 : f32
    %30 = vector.broadcast %cst_14 : f32 to vector<8x4xf32>
    %31 = arith.select %29, %19, %30 : vector<8x4xi1>, vector<8x4xf32>
    %c0_15 = arith.constant 0 : index
    %c0_16 = arith.constant 0 : index
    %32 = vector.load %arg7[%c0_15, %c0_16] : memref<8x4xf32, #tpu.memory_space<vmem>>, vector<8x4xf32>
    %33 = arith.addf %32, %31 : vector<8x4xf32>
    %c0_17 = arith.constant 0 : index
    %c0_18 = arith.constant 0 : index
    %34 = vector.load %arg7[%c0_17, %c0_18] : memref<8x4xf32, #tpu.memory_space<vmem>>, vector<8x4xf32>
    tpu.vector_store %arg7[%c0_17, %c0_18], %33 {strides = array<i32>} : memref<8x4xf32, #tpu.memory_space<vmem>>, vector<8x4xf32>,
    %c0_i32_19 = arith.constant 0 : i32
    %35 = arith.cmpi eq, %arg0, %c0_i32_19 : i32
    %36 = arith.extui %35 : i1 to i32
    %c0_i32_20 = arith.constant 0 : i32
    %37 = arith.cmpi ne, %36, %c0_i32_20 : i32
    scf.if %37 {
      %c0_21 = arith.constant 0 : index
      %c0_22 = arith.constant 0 : index
      %38 = vector.load %arg7[%c0_21, %c0_22] : memref<8x4xf32, #tpu.memory_space<vmem>>, vector<8x4xf32>
      %cst_23 = arith.constant dense<0.000000e+00> : vector<4xf32>
      %39 = vector.multi_reduction <add>, %38, %cst_23 [0] : vector<8x4xf32> to vector<4xf32>
      %40 = vector.shape_cast %39 : vector<4xf32> to vector<1x4xf32>
      %cst_24 = arith.constant dense<0.000000e+00> : vector<1xf32>
      %41 = vector.multi_reduction <add>, %40, %cst_24 [1] : vector<1x4xf32> to vector<1xf32>
      %42 = vector.shape_cast %41 : vector<1xf32> to vector<1x1xf32>
      %cst_25 = arith.constant 1.250000e-01 : f32
      %43 = vector.broadcast %cst_25 : f32 to vector<1x1xf32>
      %44 = arith.mulf %42, %43 : vector<1x1xf32>
      %c0_26 = arith.constant 0 : index
      %c0_27 = arith.constant 0 : index
      %45 = vector.load %arg6[%c0_26, %c0_27] : memref<1x1xf32, #tpu.memory_space<vmem>>, vector<1x1xf32>
      tpu.vector_store %arg6[%c0_26, %c0_27], %44 {strides = array<i32>} : memref<1x1xf32, #tpu.memory_space<vmem>>, vector<1x1xf32>,
    } else {
    }
    return
  }
  func.func @transform_0(%arg0: i32) -> (i32, i32) {
    %c0_i32 = arith.constant 0 : i32
    %c0_i32_0 = arith.constant 0 : i32
    return %arg0, %c0_i32 : i32, i32
  }
  func.func @transform_1(%arg0: i32) -> (i32, i32) {
    %c0_i32 = arith.constant 0 : i32
    %c0_i32_0 = arith.constant 0 : i32
    return %arg0, %c0_i32 : i32, i32
  }
  func.func @transform_2(%arg0: i32) -> (i32, i32) {
    %c0_i32 = arith.constant 0 : i32
    %c0_i32_0 = arith.constant 0 : i32
    return %arg0, %c0_i32 : i32, i32
  }
  func.func @transform_3(%arg0: i32) -> (i32, i32) {
    %c0_i32 = arith.constant 0 : i32
    %c0_i32_0 = arith.constant 0 : i32
    %c0_i32_1 = arith.constant 0 : i32
    return %c0_i32, %c0_i32_0 : i32, i32
  }
  func.func @transform_4(%arg0: i32) -> (i32, i32) {
    %c0_i32 = arith.constant 0 : i32
    %c0_i32_0 = arith.constant 0 : i32
    %c0_i32_1 = arith.constant 0 : i32
    return %c0_i32, %c0_i32_0 : i32, i32
  }
  func.func @transform_5(%arg0: i32) -> (i32, i32) {
    %c0_i32 = arith.constant 0 : i32
    %c0_i32_0 = arith.constant 0 : i32
    %c0_i32_1 = arith.constant 0 : i32
    return %c0_i32, %c0_i32_0 : i32, i32
  }
}

</mosaic_0001>

<bundles_post_ra>
// kernel: tpu_custom_call.1
= control target key start
LH: loop header
LB: loop body
LE: loop exit
PB: predicated region body
PF: predicated region fallthrough
CT: control target
= control target key end

     0   :  { %10 = vsyncpa [#allocation4], 0  ;;  %s468_s0 = inlined_call_operand.hbm [shape: f32[8,128], index: 0, kind: input, shape index: {}]   ;;  %s469_s1 = inlined_call_operand.hbm [shape: f32[8,128], index: 1, kind: input, shape index: {}]   ;;  %s470_s2 = inlined_call_operand.hbm [shape: f32[8,128], index: 2, kind: input, shape index: {}]   ;;  %s471_s3 = inlined_call_operand.vmem [shape: f32[128,128], index: 3, kind: input, shape index: {}]   ;;  %s472_s4 = inlined_call_operand.vmem [shape: f32[128,4], index: 4, kind: input, shape index: {}]   ;;  %s473_s5 = inlined_call_operand.hbm [shape: f32[1,1], index: 5, kind: output, shape index: {}]  }
   0x1   :  { %11 = vsyncpa [#allocation7], 0  ;;  %s29_s20 = sshll.u32 %s469_s1, 4  ;;  %s30_s20 = int_to_ptr.hbm [resolvable:$true] %s29_s20 }
   0x2   :  { %12 = vsyncpa [#allocation5], 0  ;;  %s321_s21 = smov [#allocation6]   ;;  %s18_s25 = sshll.u32 %s468_s0, 4  ;;  %s19_s25 = int_to_ptr.hbm [resolvable:$true] %s18_s25 }
   0x3   :  { %s31_s22 = sshll.u32 %s321_s21, 4  ;;  %s322_s26 = smov [#allocation3]   ;;  %s32_s22 = int_to_ptr.vmem [resolvable:$true] %s31_s22 }
   0x4   :  { %34 = dma.hbm_to_vmem [thread:$0]  %s30_s20, 128, %s32_s22, [#allocation7]  }
   0x5   :  { %s20_s27 = sshll.u32 %s322_s26, 4  ;;  %s40_s30 = sshll.u32 %s470_s2, 4  ;;  %s21_s27 = int_to_ptr.vmem [resolvable:$true] %s20_s27  ;;  %s41_s30 = int_to_ptr.hbm [resolvable:$true] %s40_s30 }
   0x6   :  { %23 = dma.hbm_to_vmem [thread:$0]  %s19_s25, 128, %s21_s27, [#allocation4]  }
   0x7   :  { %s323_s1 = smov [#allocation8]  }
   0x8   :  { %s42_s6 = sshll.u32 %s323_s1, 4  ;;  %s43_s6 = int_to_ptr.vmem [resolvable:$true] %s42_s6 }
   0x9   :  { %45 = dma.hbm_to_vmem [thread:$0]  %s41_s30, 128, %s43_s6, [#allocation7]  }
   0xa   :  { %315 = dma.done.wait [#allocation4], 128  }
   0xb   :  { %316 = vsyncadd [#allocation4], 4294967168 }
   0xc   :  { %317 = dma.done.wait [#allocation7], 256  }
   0xd   :  { %318 = vsyncadd [#allocation7], 4294967040  ;;  %v84_v0 = vld [vmem:[%s471_s3 + $0x78] sm:$0xff]  ;;  %v83_v1 = vld [vmem:[%s471_s3 + $0x70] sm:$0xff]  ;;  %vm66_vm0 = vcmask 31744   ;;  %v324_v38 = vmov 0.0   ;;  %v161_v43 = vlaneseq }
   0xe   :  { %85 = vmatpush.msra.mxu0 %v84_v0  ;;  %v82_v2 = vld [vmem:[%s471_s3 + $0x68] sm:$0xff]  ;;  %v81_v3 = vld [vmem:[%s471_s3 + $0x60] sm:$0xff]  ;;  %v124_v4 = vld [vmem:[%s472_s4 + $0x78] sm:$0xff]  ;;  %67 = vst.msk [vmem:[#allocation2] sm:$0xff] %vm66_vm0, %v324_v38  ;;  %s199_s15 = sshll.u32 %s473_s5, 4  ;;  %vm190_vm3 = vcmask 0   ;;  %s200_s15 = int_to_ptr.hbm [resolvable:$true] %s199_s15 }
   0xf   :  { %v80_v5 = vld [vmem:[%s471_s3 + $0x58] sm:$0xff]  ;;  %125 = vmatpush.msra.mxu1 %v124_v4  ;;  %v123_v6 = vld [vmem:[%s472_s4 + $0x70] sm:$0xff]  ;;  %v122_v7 = vld [vmem:[%s472_s4 + $0x68] sm:$0xff]  ;;  %v162_v45 = vshrl.u32 %v161_v43, 7  ;;  %v166_v48 = vand.u32 127, %v161_v43 }
  0x10   :  { %86 = vmatpush.msra.mxu0 %v83_v1  ;;  %v79_v8 = vld [vmem:[%s471_s3 + $0x50] sm:$0xff]  ;;  %v121_v9 = vld [vmem:[%s472_s4 + $0x60] sm:$0xff]  ;;  %v78_v10 = vld [vmem:[%s471_s3 + $0x48] sm:$0xff] }
  0x11   :  { %126 = vmatpush.msra.mxu1 %v123_v6  ;;  %v120_v11 = vld [vmem:[%s472_s4 + $0x58] sm:$0xff]  ;;  %v77_v12 = vld [vmem:[%s471_s3 + $0x40] sm:$0xff]  ;;  %v119_v13 = vld [vmem:[%s472_s4 + $0x50] sm:$0xff]  ;;  %v167_v49 = vmul.u32 4, %v162_v45 }
  0x12   :  { %87 = vmatpush.msra.mxu0 %v82_v2  ;;  %v76_v14 = vld [vmem:[%s471_s3 + $0x38] sm:$0xff]  ;;  %v118_v15 = vld [vmem:[%s472_s4 + $0x48] sm:$0xff]  ;;  %v75_v16 = vld [vmem:[%s471_s3 + $0x30] sm:$0xff] }
  0x13   :  { %127 = vmatpush.msra.mxu1 %v122_v7  ;;  %v117_v17 = vld [vmem:[%s472_s4 + $0x40] sm:$0xff]  ;;  %v74_v18 = vld [vmem:[%s471_s3 + $0x28] sm:$0xff]  ;;  %v116_v19 = vld [vmem:[%s472_s4 + $0x38] sm:$0xff]  ;;  %v168_v52 = vadd.s32 %v167_v49, %v166_v48 }
  0x14   :  { %88 = vmatpush.msra.mxu0 %v81_v3  ;;  %v73_v20 = vld [vmem:[%s471_s3 + $0x20] sm:$0xff]  ;;  %v115_v21 = vld [vmem:[%s472_s4 + $0x30] sm:$0xff]  ;;  %v72_v22 = vld [vmem:[%s471_s3 + $0x18] sm:$0xff] }
  0x15   :  { %128 = vmatpush.msra.mxu1 %v121_v9  ;;  %v114_v23 = vld [vmem:[%s472_s4 + $0x28] sm:$0xff]  ;;  %v71_v24 = vld [vmem:[%s471_s3 + $0x10] sm:$0xff]  ;;  %v113_v25 = vld [vmem:[%s472_s4 + $0x20] sm:$0xff]  ;;  %vm169_vm2 = vcmp.lt.s32.totalorder %v168_v52, 8 }
  0x16   :  { %89 = vmatpush.msra.mxu0 %v80_v5  ;;  %v70_v26 = vld [vmem:[%s471_s3 + $0x8] sm:$0xff]  ;;  %v112_v27 = vld [vmem:[%s472_s4 + $0x18] sm:$0xff]  ;;  %v69_v28 = vld [vmem:[%s471_s3] sm:$0xff]  ;;  %s325_s3 = smov [#allocation9]  }
  0x17   :  { %129 = vmatpush.msra.mxu1 %v120_v11  ;;  %v68_v29 = vld [vmem:[#allocation3] sm:$0xff]  ;;  %v111_v30 = vld [vmem:[%s472_s4 + $0x10] sm:$0xff]  ;;  %v109_v32 = vld [vmem:[%s472_s4] sm:$0xff] }
  0x18   :  { %90 = vmatpush.msra.mxu0 %v79_v8  ;;  %v110_v31 = vld [vmem:[%s472_s4 + $0x8] sm:$0xff]  ;;  %v105_v33 = vld [vmem:[#allocation6] sm:$0xff]  ;;  %v106_v34 = vld [vmem:[#allocation8] sm:$0xff]  ;;  %s197_s4 = sshll.u32 %s325_s3, 4  ;;  %s198_s4 = int_to_ptr.vmem [resolvable:$true] %s197_s4 }
  0x19   :  { %130 = vmatpush.msra.mxu1 %v119_v13  ;;  %v107_v35 = vsub.f32 %v105_v33, %v106_v34  ;;  %v171_v59 = vld [vmem:[#allocation2] sm:$0xff] }
  0x1a   :  { %91 = vmatpush.msra.mxu0 %v78_v10 }
  0x1b   :  { %131 = vmatpush.msra.mxu1 %v118_v15 }
  0x1c   :  { %92 = vmatpush.msra.mxu0 %v77_v12 }
  0x1d   :  { %132 = vmatpush.msra.mxu1 %v117_v17 }
  0x1e   :  { %93 = vmatpush.msra.mxu0 %v76_v14 }
  0x1f   :  { %133 = vmatpush.msra.mxu1 %v116_v19 }
  0x20   :  { %94 = vmatpush.msra.mxu0 %v75_v16 }
  0x21   :  { %134 = vmatpush.msra.mxu1 %v115_v21 }
  0x22   :  { %95 = vmatpush.msra.mxu0 %v74_v18 }
  0x23   :  { %135 = vmatpush.msra.mxu1 %v114_v23 }
  0x24   :  { %96 = vmatpush.msra.mxu0 %v73_v20 }
  0x25   :  { %136 = vmatpush.msra.mxu1 %v113_v25 }
  0x26   :  { %97 = vmatpush.msra.mxu0 %v72_v22 }
  0x27   :  { %137 = vmatpush.msra.mxu1 %v112_v27 }
  0x28   :  { %98 = vmatpush.msra.mxu0 %v71_v24 }
  0x29   :  { %138 = vmatpush.msra.mxu1 %v111_v30 }
  0x2a   :  { %99 = vmatpush.msra.mxu0 %v70_v26 }
  0x2b   :  { %139 = vmatpush.msra.mxu1 %v110_v31 }
  0x2c   :  { %100 = vmatpush.msra.mxu0 %v69_v28 }
  0x2d   :  { %101 = vmatmul.f32.vlgmr.msra.gmra.mxu0 %v68_v29  ;;  %140 = vmatpush.msra.mxu1 %v109_v32 }
  0xaa   :  { %v102_v36 = vpop.f32.mrf.mxu0 }
  0xab   :  { %v108_v37 = vmul.f32 %v107_v35, %v102_v36 }
  0xad   :  { %141 = vmatmul.f32.vlgmr.msra.gmra.mxu1 %v108_v37 }
 0x12a   :  { %v142_v39 = vpop.f32.mrf.mxu1 }
 0x12b   :  { %v146_v40 = vand.u32 2147483647, %v142_v39  ;;  %v145_v56 = vmin.f32 %v142_v39, 0.0 }
 0x12d   :  { %v147_v41 = vsub.f32 0.0, %v146_v40 }
 0x12f   :  { %v148_v42 = vmul.f32 1.442695, %v147_v41 }
 0x131   :  { %215 = vpow2.f32 %v148_v42 }
 0x137   :  { %v216_v44 = vpop.eup %215 }
 0x138   :  { %v150_v46 = vadd.f32 1.0, %v216_v44  ;;  %v153_v47 = vmul.f32 -0.5, %v216_v44  ;;  %v156_v51 = vand.u32 2147483647, %v216_v44 }
 0x13a   :  { %217 = vlog2.f32 %v150_v46  ;;  %v154_v50 = vadd.f32 1.0, %v153_v47  ;;  %vm157_vm1 = vcmp.lt.f32.partialorder %v156_v51, 0.0004427343 }
 0x13c   :  { %v155_v55 = vmul.f32 %v216_v44, %v154_v50 }
 0x140   :  { %v218_v53 = vpop.eup %217 }
 0x141   :  { %v152_v54 = vmul.f32 0.6931472, %v218_v53 }
 0x143   :  { %v158_v57 = vsel %vm157_vm1, %v155_v55, %v152_v54 }
 0x144   :  { %v159_v58 = vsub.f32 %v145_v56, %v158_v57 }
 0x146   :  { %v170_v60 = vsel %vm169_vm2, %v159_v58, 0.0 }
 0x147   :  { %v172_v61 = vadd.f32 %v171_v59, %v170_v60 }
 0x149   :  { %174 = vst.msk [vmem:[#allocation2] sm:$0xff] %vm66_vm0, %v172_v61 }
 0x150   :  { %v178_v62 = vld [vmem:[#allocation2] sm:$0xff] }
 0x151   :  { %v179_v63 = vsel %vm66_vm0, %v178_v62, 0.0 }
 0x152   :  { %v180_v0 = vrot.slane %v179_v63, 4 }
 0x154   :  { %v181_v1 = vadd.f32 %v180_v0, %v179_v63 }
 0x156   :  { %v182_v2 = vrot.slane %v181_v1, 2 }
 0x158   :  { %v183_v3 = vadd.f32 %v182_v2, %v181_v1 }
 0x15a   :  { %v184_v4 = vrot.slane %v183_v3, 1 }
 0x15c   :  { %v185_v5 = vadd.f32 %v184_v4, %v183_v3 }
 0x15e   :  { %v186_v6 = vsel %vm66_vm0, %v185_v5, 0.0 }
 0x15f   :  { %187 = vadd.xlane.f32.xlu0 %v186_v6 }
 0x1d2   :  { %v188_v7 = vpop.xlane.xlu0 %187 }
 0x1d3   :  { %v189_v8 = vmul.f32 0.125, %v188_v7 }
 0x1d5   :  { %191 = vst.msk [vmem:[#allocation9] sm:$0x1] %vm190_vm3, %v189_v8 }
 0x1d6   :  { %202 = dma.vmem_to_hbm [thread:$0]  %s198_s4, 16, %s200_s15, [#allocation5]  }
 0x1d7   :  { %319 = dma.done.wait [#allocation5], 16  }
 0x1d8   :  { %320 = vsyncadd [#allocation5], 4294967280 }
 0x1d9   :  { %207 = vsyncpa [#allocation4], 1 }
 0x1da   :  { %208 = vsyncpa [#allocation7], 1 }
 0x1db   :  { %209 = vsyncpa [#allocation5], 1 }

</bundles_post_ra>
